<compile_context>
chip_gen: v7x
topology: tpu7x:2x2x1
jax: 0.10.0
libtpu: 0.0.40
codegen_flags: <defaults>
</compile_context>

<pallas_src>
import functools

import jax
import jax.numpy as jnp
from jax.experimental import pallas as pl
from jax.experimental.pallas import tpu as pltpu

EPS = 1e-5


def _basic_block_kernel(x_ref, w1_ref, g1_ref, b1_ref, w2_ref, g2_ref, b2_ref,
                        o_ref, xpad_ref, *, ksize, pad):
    # x_ref    : (N, L, C)  f32   unpadded input, NLC layout, true channel count C
    # w1_ref   : (K, Cp, Cp) bf16 conv1 weight, [k] maps (in-ch -> out-ch)
    # w2_ref   : (K, Cp, Cp) bf16 conv2 weight
    # g*/b*    : (1, Cp) f32      batchnorm affine params (gamma padded with 1, beta with 0)
    # o_ref    : (N, L, C)
    # xpad_ref : VMEM scratch (N, L + 2*pad, Cp) bf16, reused for both convs
    N, L, C = x_ref.shape
    _, Lp, Cp = xpad_ref.shape
    inv_n = 1.0 / float(N * L)

    # One cheap full-extent zero: halo rows and padded channel lanes stay 0 afterwards
    # (interior rows are always overwritten full-width below).
    xpad_ref[...] = jnp.zeros((N, Lp, Cp), xpad_ref.dtype)

    def conv(w_ref):
        # K accumulating MXU matmuls over the shifted bf16 views; f32 accumulation.
        xp = xpad_ref[...]                                        # (N, Lp, Cp) bf16 (small)
        acc = jnp.zeros((N * L, Cp), jnp.float32)
        for k in range(ksize):
            xk = xp[:, k:k + L, :].reshape(N * L, Cp)
            acc = acc + jnp.dot(xk, w_ref[k], preferred_element_type=jnp.float32)
        return acc                                                # (N*L, Cp) f32

    def bn(acc, g_ref, b_ref):
        # Train-mode batch stats (biased variance), shifted two-pass for numerical safety.
        m = jnp.sum(acc, axis=0, keepdims=True) * inv_n
        d = acc - m
        v = jnp.sum(d * d, axis=0, keepdims=True) * inv_n
        scale = jax.lax.rsqrt(v + EPS) * g_ref[...]
        return d * scale + b_ref[...]

    # ---- conv1 -> bn1 -> relu ---------------------------------------------------------
    x_bf = x_ref[...].astype(jnp.bfloat16)                        # cast each element once
    if Cp > C:
        x_bf = jnp.concatenate(
            [x_bf, jnp.zeros((N, L, Cp - C), jnp.bfloat16)], axis=-1)
    xpad_ref[:, pad:pad + L, :] = x_bf
    out1 = jnp.maximum(bn(conv(w1_ref), g1_ref, b1_ref), 0.0)     # padded lanes stay exactly 0

    # ---- conv2 -> bn2 (bn1 output goes straight back into the scratch interior) --------
    xpad_ref[:, pad:pad + L, :] = out1.reshape(N, L, Cp).astype(xpad_ref.dtype)
    out2 = bn(conv(w2_ref), g2_ref, b2_ref)                       # (N*L, Cp) f32

    # ---- identity residual (re-read the VMEM-resident input) + final relu --------------
    res = x_ref[...].astype(jnp.float32).reshape(N * L, C)
    out = jnp.maximum(out2[:, :C] + res, 0.0)
    o_ref[...] = out.reshape(N, L, C).astype(o_ref.dtype)


@functools.partial(jax.jit, static_argnames=("padding",))
def basic_block_forward(x_ncl, w1, g1, b1, w2, g2, b2, *, padding):
    """x_ncl: (N, Cin, L) like PyTorch Conv1d input. Returns (N, Cout, L)."""
    N, Cin, L = x_ncl.shape
    Cout, _, K = w1.shape
    assert Cin == Cout, "identity residual requires in_channels == out_channels"
    assert L + 2 * padding - K + 1 == L, "padding must preserve length (stride=1)"

    C = Cin
    Cp = ((C + 127) // 128) * 128            # lane-dense channel count inside the kernel
    Lp = L + 2 * padding

    # NCL -> NLC at the TRUE channel count (HBM traffic scales with C, not Cp).
    x_nlc = jnp.transpose(x_ncl, (0, 2, 1))

    def pack_w(w):                            # (Cout, Cin, K) -> (K, Cp, Cp), bf16
        wt = jnp.transpose(w, (2, 1, 0))      # (K, Cin, Cout): rows = in-ch, cols = out-ch
        return jnp.pad(wt, ((0, 0), (0, Cp - C), (0, Cp - C))).astype(jnp.bfloat16)

    def pack_gamma(g):                        # pad with 1 (padded lanes have zero stats anyway)
        return jnp.pad(g, (0, Cp - C), constant_values=1.0).reshape(1, Cp).astype(jnp.float32)

    def pack_beta(b):                         # pad with 0 so padded channels stay exactly 0
        return jnp.pad(b, (0, Cp - C)).reshape(1, Cp).astype(jnp.float32)

    kernel = functools.partial(_basic_block_kernel, ksize=K, pad=padding)
    vmem = pl.BlockSpec(memory_space=pltpu.MemorySpace.VMEM)

    # VMEM budget from the actual buffer footprint (cap 48 MiB: safe on v7x's 64 MiB).
    scratch_bytes = N * Lp * Cp * 2
    io_bytes = 2 * N * L * C * 4
    param_bytes = 2 * K * Cp * Cp * 2 + 4 * Cp * 4
    live_bytes = 4 * N * L * Cp * 4            # f32 accumulators / bn intermediates headroom
    vmem_budget = int(min(48 * 1024 * 1024,
                          max(16 * 1024 * 1024,
                              2 * (scratch_bytes + io_bytes + param_bytes + live_bytes))))

    flops = 2 * K * 2 * (N * L) * Cp * Cp + 24 * N * L * Cp
    bytes_accessed = io_bytes + param_bytes

    out_nlc = pl.pallas_call(
        kernel,
        out_shape=jax.ShapeDtypeStruct((N, L, C), x_ncl.dtype),
        in_specs=[vmem] * 7,
        out_specs=vmem,
        scratch_shapes=[pltpu.VMEM((N, Lp, Cp), jnp.bfloat16)],
        compiler_params=pltpu.CompilerParams(vmem_limit_bytes=vmem_budget),
        cost_estimate=pl.CostEstimate(flops=flops, transcendentals=2 * Cp,
                                      bytes_accessed=bytes_accessed),
    )(x_nlc, pack_w(w1), pack_gamma(g1), pack_beta(b1),
      pack_w(w2), pack_gamma(g2), pack_beta(b2))

    return jnp.transpose(out_nlc, (0, 2, 1))   # NLC -> NCL


def _reference_forward(x_ncl, w1, g1, b1, w2, g2, b2, padding):
    """Pure-JAX f32 reference mirroring the PyTorch module (train-mode BN)."""
    x = jnp.transpose(x_ncl, (0, 2, 1)).astype(jnp.float32)  # NLC
    L = x.shape[1]

    def conv(inp, w):                                        # w: (Cout, Cin, K)
        xp = jnp.pad(inp, ((0, 0), (padding, padding), (0, 0)))
        K = w.shape[2]
        return sum(jnp.einsum("nlc,oc->nlo", xp[:, k:k + L, :], w[:, :, k])
                   for k in range(K))

    def bn(inp, g, b):
        m = inp.mean(axis=(0, 1), keepdims=True)
        v = ((inp - m) ** 2).mean(axis=(0, 1), keepdims=True)
        return (inp - m) / jnp.sqrt(v + EPS) * g.reshape(1, 1, -1) + b.reshape(1, 1, -1)

    out = jnp.maximum(bn(conv(x, w1), g1, b1), 0.0)
    out = bn(conv(out, w2), g2, b2)
    out = jnp.maximum(out + x, 0.0)
    return jnp.transpose(out, (0, 2, 1))


if __name__ == "__main__":
    # Small shapes consistent with the module: Conv1d input (N, C, L).
    N, C, L, K = 2, 8, 16, 3
    padding = (K - 1) // 2  # keeps length, so the identity residual is valid

    key = jax.random.PRNGKey(0)
    kx, kw1, kw2, kg1, kb1, kg2, kb2 = jax.random.split(key, 7)
    x = jax.random.normal(kx, (N, C, L), jnp.float32)
    w1 = jax.random.normal(kw1, (C, C, K), jnp.float32) * 0.1            # conv1.weight
    w2 = jax.random.normal(kw2, (C, C, K), jnp.float32) * 0.1            # conv2.weight
    g1 = 1.0 + 0.1 * jax.random.normal(kg1, (C,), jnp.float32)           # bn1.weight
    b1 = 0.1 * jax.random.normal(kb1, (C,), jnp.float32)                 # bn1.bias
    g2 = 1.0 + 0.1 * jax.random.normal(kg2, (C,), jnp.float32)           # bn2.weight
    b2 = 0.1 * jax.random.normal(kb2, (C,), jnp.float32)                 # bn2.bias

    out = basic_block_forward(x, w1, g1, b1, w2, g2, b2, padding=padding)
    out = jax.block_until_ready(out)

    ref = _reference_forward(x, w1, g1, b1, w2, g2, b2, padding)
    assert out.shape == (N, C, L), out.shape
    # bf16 MXU operands (f32 accumulation) vs the pure-f32 reference -> relaxed tolerance.
    max_err = float(jnp.max(jnp.abs(out - ref)))
    assert jnp.allclose(out, ref, atol=5e-2, rtol=5e-2), f"mismatch vs reference (max err {max_err})"
    print("KERNEL_OK")
</pallas_src>

<mosaic_0001>
module attributes {stable_mosaic.version = 11 : i64} {
  func.func @_basic_block_kernel(%arg0: memref<2x16x8xf32, #tpu.memory_space<vmem>>, %arg1: memref<3x128x128xbf16, #tpu.memory_space<vmem>>, %arg2: memref<1x128xf32, #tpu.memory_space<vmem>>, %arg3: memref<1x128xf32, #tpu.memory_space<vmem>>, %arg4: memref<3x128x128xbf16, #tpu.memory_space<vmem>>, %arg5: memref<1x128xf32, #tpu.memory_space<vmem>>, %arg6: memref<1x128xf32, #tpu.memory_space<vmem>>, %arg7: memref<2x16x8xf32, #tpu.memory_space<vmem>>, %arg8: memref<2x18x128xbf16, #tpu.memory_space<vmem>>) attributes {dimension_semantics = [], scalar_prefetch = 0 : i64, scratch_operands = 1 : i64, tpu.core_type = #tpu.core_type<tc>} {
    %cst = arith.constant 0.000000e+00 : bf16
    %0 = vector.broadcast %cst : bf16 to vector<2x18x128xbf16>
    %c0 = arith.constant 0 : index
    %c0_0 = arith.constant 0 : index
    %c0_1 = arith.constant 0 : index
    %1 = vector.load %arg8[%c0, %c0_0, %c0_1] : memref<2x18x128xbf16, #tpu.memory_space<vmem>>, vector<2x18x128xbf16>
    tpu.vector_store %arg8[%c0, %c0_0, %c0_1], %0 {strides = array<i32>} : memref<2x18x128xbf16, #tpu.memory_space<vmem>>, vector<2x18x128xbf16>,
    %c0_2 = arith.constant 0 : index
    %c0_3 = arith.constant 0 : index
    %c0_4 = arith.constant 0 : index
    %2 = vector.load %arg0[%c0_2, %c0_3, %c0_4] : memref<2x16x8xf32, #tpu.memory_space<vmem>>, vector<2x16x8xf32>
    %3 = arith.truncf %2 : vector<2x16x8xf32> to vector<2x16x8xbf16>
    %cst_5 = arith.constant 0.000000e+00 : bf16
    %4 = vector.broadcast %cst_5 : bf16 to vector<2x16x120xbf16>
    %5 = tpu.concatenate %3, %4 in 2 : vector<2x16x8xbf16>, vector<2x16x120xbf16> -> vector<2x16x128xbf16>
    %c0_6 = arith.constant 0 : index
    %c1 = arith.constant 1 : index
    %c0_7 = arith.constant 0 : index
    %6 = vector.load %arg8[%c0_6, %c1, %c0_7] : memref<2x18x128xbf16, #tpu.memory_space<vmem>>, vector<2x16x128xbf16>
    tpu.vector_store %arg8[%c0_6, %c1, %c0_7], %5 {strides = array<i32>} : memref<2x18x128xbf16, #tpu.memory_space<vmem>>, vector<2x16x128xbf16>,
    %c0_8 = arith.constant 0 : index
    %c0_9 = arith.constant 0 : index
    %c0_10 = arith.constant 0 : index
    %7 = vector.load %arg8[%c0_8, %c0_9, %c0_10] : memref<2x18x128xbf16, #tpu.memory_space<vmem>>, vector<2x18x128xbf16>
    %cst_11 = arith.constant 0.000000e+00 : f32
    %8 = vector.broadcast %cst_11 : f32 to vector<32x128xf32>
    %9 = vector.extract_strided_slice %7 {offsets = [0, 0, 0], sizes = [2, 16, 128], strides = [1, 1, 1]} : vector<2x18x128xbf16> to vector<2x16x128xbf16>
    %10 = vector.shape_cast %9 : vector<2x16x128xbf16> to vector<32x128xbf16>
    %c0_12 = arith.constant 0 : index
    %c0_13 = arith.constant 0 : index
    %c0_14 = arith.constant 0 : index
    %11 = vector.load %arg1[%c0_12, %c0_13, %c0_14] : memref<3x128x128xbf16, #tpu.memory_space<vmem>>, vector<1x128x128xbf16>
    %12 = vector.shape_cast %11 : vector<1x128x128xbf16> to vector<128x128xbf16>
    %cst_15 = arith.constant dense<0.000000e+00> : vector<32x128xf32>
    %13 = tpu.matmul %10, %12, %cst_15 {dimension_numbers = #tpu.dot_dimension_numbers<[1], [0], [0], [1], [0, 0, 1, 1], [], []>} : vector<32x128xbf16>, vector<128x128xbf16>, vector<32x128xf32> -> vector<32x128xf32>
    %14 = arith.addf %8, %13 : vector<32x128xf32>
    %15 = vector.extract_strided_slice %7 {offsets = [0, 1, 0], sizes = [2, 16, 128], strides = [1, 1, 1]} : vector<2x18x128xbf16> to vector<2x16x128xbf16>
    %16 = vector.shape_cast %15 : vector<2x16x128xbf16> to vector<32x128xbf16>
    %c1_16 = arith.constant 1 : index
    %c0_17 = arith.constant 0 : index
    %c0_18 = arith.constant 0 : index
    %17 = vector.load %arg1[%c1_16, %c0_17, %c0_18] : memref<3x128x128xbf16, #tpu.memory_space<vmem>>, vector<1x128x128xbf16>
    %18 = vector.shape_cast %17 : vector<1x128x128xbf16> to vector<128x128xbf16>
    %cst_19 = arith.constant dense<0.000000e+00> : vector<32x128xf32>
    %19 = tpu.matmul %16, %18, %cst_19 {dimension_numbers = #tpu.dot_dimension_numbers<[1], [0], [0], [1], [0, 0, 1, 1], [], []>} : vector<32x128xbf16>, vector<128x128xbf16>, vector<32x128xf32> -> vector<32x128xf32>
    %20 = arith.addf %14, %19 : vector<32x128xf32>
    %21 = vector.extract_strided_slice %7 {offsets = [0, 2, 0], sizes = [2, 16, 128], strides = [1, 1, 1]} : vector<2x18x128xbf16> to vector<2x16x128xbf16>
    %22 = vector.shape_cast %21 : vector<2x16x128xbf16> to vector<32x128xbf16>
    %c2 = arith.constant 2 : index
    %c0_20 = arith.constant 0 : index
    %c0_21 = arith.constant 0 : index
    %23 = vector.load %arg1[%c2, %c0_20, %c0_21] : memref<3x128x128xbf16, #tpu.memory_space<vmem>>, vector<1x128x128xbf16>
    %24 = vector.shape_cast %23 : vector<1x128x128xbf16> to vector<128x128xbf16>
    %cst_22 = arith.constant dense<0.000000e+00> : vector<32x128xf32>
    %25 = tpu.matmul %22, %24, %cst_22 {dimension_numbers = #tpu.dot_dimension_numbers<[1], [0], [0], [1], [0, 0, 1, 1], [], []>} : vector<32x128xbf16>, vector<128x128xbf16>, vector<32x128xf32> -> vector<32x128xf32>
    %26 = arith.addf %20, %25 : vector<32x128xf32>
    %cst_23 = arith.constant dense<0.000000e+00> : vector<128xf32>
    %27 = vector.multi_reduction <add>, %26, %cst_23 [0] : vector<32x128xf32> to vector<128xf32>
    %28 = vector.shape_cast %27 : vector<128xf32> to vector<1x128xf32>
    %cst_24 = arith.constant 3.125000e-02 : f32
    %29 = vector.broadcast %cst_24 : f32 to vector<1x128xf32>
    %30 = arith.mulf %28, %29 : vector<1x128xf32>
    %31 = vector.broadcast %30 : vector<1x128xf32> to vector<32x128xf32>
    %32 = arith.subf %26, %31 : vector<32x128xf32>
    %33 = arith.mulf %32, %32 : vector<32x128xf32>
    %cst_25 = arith.constant dense<0.000000e+00> : vector<128xf32>
    %34 = vector.multi_reduction <add>, %33, %cst_25 [0] : vector<32x128xf32> to vector<128xf32>
    %35 = vector.shape_cast %34 : vector<128xf32> to vector<1x128xf32>
    %cst_26 = arith.constant 3.125000e-02 : f32
    %36 = vector.broadcast %cst_26 : f32 to vector<1x128xf32>
    %37 = arith.mulf %35, %36 : vector<1x128xf32>
    %cst_27 = arith.constant 9.99999974E-6 : f32
    %38 = vector.broadcast %cst_27 : f32 to vector<1x128xf32>
    %39 = arith.addf %37, %38 : vector<1x128xf32>
    %40 = math.rsqrt %39 : vector<1x128xf32>
    %c0_28 = arith.constant 0 : index
    %c0_29 = arith.constant 0 : index
    %41 = vector.load %arg2[%c0_28, %c0_29] : memref<1x128xf32, #tpu.memory_space<vmem>>, vector<1x128xf32>
    %42 = arith.mulf %40, %41 : vector<1x128xf32>
    %43 = vector.broadcast %42 : vector<1x128xf32> to vector<32x128xf32>
    %44 = arith.mulf %32, %43 : vector<32x128xf32>
    %c0_30 = arith.constant 0 : index
    %c0_31 = arith.constant 0 : index
    %45 = vector.load %arg3[%c0_30, %c0_31] : memref<1x128xf32, #tpu.memory_space<vmem>>, vector<1x128xf32>
    %46 = vector.broadcast %45 : vector<1x128xf32> to vector<32x128xf32>
    %47 = arith.addf %44, %46 : vector<32x128xf32>
    %cst_32 = arith.constant 0.000000e+00 : f32
    %48 = vector.broadcast %cst_32 : f32 to vector<32x128xf32>
    %49 = arith.maximumf %47, %48 : vector<32x128xf32>
    %50 = vector.shape_cast %49 : vector<32x128xf32> to vector<2x16x128xf32>
    %51 = arith.truncf %50 : vector<2x16x128xf32> to vector<2x16x128xbf16>
    %c0_33 = arith.constant 0 : index
    %c1_34 = arith.constant 1 : index
    %c0_35 = arith.constant 0 : index
    %52 = vector.load %arg8[%c0_33, %c1_34, %c0_35] : memref<2x18x128xbf16, #tpu.memory_space<vmem>>, vector<2x16x128xbf16>
    tpu.vector_store %arg8[%c0_33, %c1_34, %c0_35], %51 {strides = array<i32>} : memref<2x18x128xbf16, #tpu.memory_space<vmem>>, vector<2x16x128xbf16>,
    %c0_36 = arith.constant 0 : index
    %c0_37 = arith.constant 0 : index
    %c0_38 = arith.constant 0 : index
    %53 = vector.load %arg8[%c0_36, %c0_37, %c0_38] : memref<2x18x128xbf16, #tpu.memory_space<vmem>>, vector<2x18x128xbf16>
    %cst_39 = arith.constant 0.000000e+00 : f32
    %54 = vector.broadcast %cst_39 : f32 to vector<32x128xf32>
    %55 = vector.extract_strided_slice %53 {offsets = [0, 0, 0], sizes = [2, 16, 128], strides = [1, 1, 1]} : vector<2x18x128xbf16> to vector<2x16x128xbf16>
    %56 = vector.shape_cast %55 : vector<2x16x128xbf16> to vector<32x128xbf16>
    %c0_40 = arith.constant 0 : index
    %c0_41 = arith.constant 0 : index
    %c0_42 = arith.constant 0 : index
    %57 = vector.load %arg4[%c0_40, %c0_41, %c0_42] : memref<3x128x128xbf16, #tpu.memory_space<vmem>>, vector<1x128x128xbf16>
    %58 = vector.shape_cast %57 : vector<1x128x128xbf16> to vector<128x128xbf16>
    %cst_43 = arith.constant dense<0.000000e+00> : vector<32x128xf32>
    %59 = tpu.matmul %56, %58, %cst_43 {dimension_numbers = #tpu.dot_dimension_numbers<[1], [0], [0], [1], [0, 0, 1, 1], [], []>} : vector<32x128xbf16>, vector<128x128xbf16>, vector<32x128xf32> -> vector<32x128xf32>
    %60 = arith.addf %54, %59 : vector<32x128xf32>
    %61 = vector.extract_strided_slice %53 {offsets = [0, 1, 0], sizes = [2, 16, 128], strides = [1, 1, 1]} : vector<2x18x128xbf16> to vector<2x16x128xbf16>
    %62 = vector.shape_cast %61 : vector<2x16x128xbf16> to vector<32x128xbf16>
    %c1_44 = arith.constant 1 : index
    %c0_45 = arith.constant 0 : index
    %c0_46 = arith.constant 0 : index
    %63 = vector.load %arg4[%c1_44, %c0_45, %c0_46] : memref<3x128x128xbf16, #tpu.memory_space<vmem>>, vector<1x128x128xbf16>
    %64 = vector.shape_cast %63 : vector<1x128x128xbf16> to vector<128x128xbf16>
    %cst_47 = arith.constant dense<0.000000e+00> : vector<32x128xf32>
    %65 = tpu.matmul %62, %64, %cst_47 {dimension_numbers = #tpu.dot_dimension_numbers<[1], [0], [0], [1], [0, 0, 1, 1], [], []>} : vector<32x128xbf16>, vector<128x128xbf16>, vector<32x128xf32> -> vector<32x128xf32>
    %66 = arith.addf %60, %65 : vector<32x128xf32>
    %67 = vector.extract_strided_slice %53 {offsets = [0, 2, 0], sizes = [2, 16, 128], strides = [1, 1, 1]} : vector<2x18x128xbf16> to vector<2x16x128xbf16>
    %68 = vector.shape_cast %67 : vector<2x16x128xbf16> to vector<32x128xbf16>
    %c2_48 = arith.constant 2 : index
    %c0_49 = arith.constant 0 : index
    %c0_50 = arith.constant 0 : index
    %69 = vector.load %arg4[%c2_48, %c0_49, %c0_50] : memref<3x128x128xbf16, #tpu.memory_space<vmem>>, vector<1x128x128xbf16>
    %70 = vector.shape_cast %69 : vector<1x128x128xbf16> to vector<128x128xbf16>
    %cst_51 = arith.constant dense<0.000000e+00> : vector<32x128xf32>
    %71 = tpu.matmul %68, %70, %cst_51 {dimension_numbers = #tpu.dot_dimension_numbers<[1], [0], [0], [1], [0, 0, 1, 1], [], []>} : vector<32x128xbf16>, vector<128x128xbf16>, vector<32x128xf32> -> vector<32x128xf32>
    %72 = arith.addf %66, %71 : vector<32x128xf32>
    %cst_52 = arith.constant dense<0.000000e+00> : vector<128xf32>
    %73 = vector.multi_reduction <add>, %72, %cst_52 [0] : vector<32x128xf32> to vector<128xf32>
    %74 = vector.shape_cast %73 : vector<128xf32> to vector<1x128xf32>
    %cst_53 = arith.constant 3.125000e-02 : f32
    %75 = vector.broadcast %cst_53 : f32 to vector<1x128xf32>
    %76 = arith.mulf %74, %75 : vector<1x128xf32>
    %77 = vector.broadcast %76 : vector<1x128xf32> to vector<32x128xf32>
    %78 = arith.subf %72, %77 : vector<32x128xf32>
    %79 = arith.mulf %78, %78 : vector<32x128xf32>
    %cst_54 = arith.constant dense<0.000000e+00> : vector<128xf32>
    %80 = vector.multi_reduction <add>, %79, %cst_54 [0] : vector<32x128xf32> to vector<128xf32>
    %81 = vector.shape_cast %80 : vector<128xf32> to vector<1x128xf32>
    %cst_55 = arith.constant 3.125000e-02 : f32
    %82 = vector.broadcast %cst_55 : f32 to vector<1x128xf32>
    %83 = arith.mulf %81, %82 : vector<1x128xf32>
    %cst_56 = arith.constant 9.99999974E-6 : f32
    %84 = vector.broadcast %cst_56 : f32 to vector<1x128xf32>
    %85 = arith.addf %83, %84 : vector<1x128xf32>
    %86 = math.rsqrt %85 : vector<1x128xf32>
    %c0_57 = arith.constant 0 : index
    %c0_58 = arith.constant 0 : index
    %87 = vector.load %arg5[%c0_57, %c0_58] : memref<1x128xf32, #tpu.memory_space<vmem>>, vector<1x128xf32>
    %88 = arith.mulf %86, %87 : vector<1x128xf32>
    %89 = vector.broadcast %88 : vector<1x128xf32> to vector<32x128xf32>
    %90 = arith.mulf %78, %89 : vector<32x128xf32>
    %c0_59 = arith.constant 0 : index
    %c0_60 = arith.constant 0 : index
    %91 = vector.load %arg6[%c0_59, %c0_60] : memref<1x128xf32, #tpu.memory_space<vmem>>, vector<1x128xf32>
    %92 = vector.broadcast %91 : vector<1x128xf32> to vector<32x128xf32>
    %93 = arith.addf %90, %92 : vector<32x128xf32>
    %c0_61 = arith.constant 0 : index
    %c0_62 = arith.constant 0 : index
    %c0_63 = arith.constant 0 : index
    %94 = vector.load %arg0[%c0_61, %c0_62, %c0_63] : memref<2x16x8xf32, #tpu.memory_space<vmem>>, vector<2x16x8xf32>
    %95 = vector.shape_cast %94 : vector<2x16x8xf32> to vector<32x8xf32>
    %96 = vector.extract_strided_slice %93 {offsets = [0, 0], sizes = [32, 8], strides = [1, 1]} : vector<32x128xf32> to vector<32x8xf32>
    %97 = arith.addf %96, %95 : vector<32x8xf32>
    %cst_64 = arith.constant 0.000000e+00 : f32
    %98 = vector.broadcast %cst_64 : f32 to vector<32x8xf32>
    %99 = arith.maximumf %97, %98 : vector<32x8xf32>
    %100 = vector.shape_cast %99 : vector<32x8xf32> to vector<2x16x8xf32>
    %c0_65 = arith.constant 0 : index
    %c0_66 = arith.constant 0 : index
    %c0_67 = arith.constant 0 : index
    %101 = vector.load %arg7[%c0_65, %c0_66, %c0_67] : memref<2x16x8xf32, #tpu.memory_space<vmem>>, vector<2x16x8xf32>
    tpu.vector_store %arg7[%c0_65, %c0_66, %c0_67], %100 {strides = array<i32>} : memref<2x16x8xf32, #tpu.memory_space<vmem>>, vector<2x16x8xf32>,
    return
  }
}

</mosaic_0001>

<bundles_post_ra>
// kernel: basic_block_forward.1
= control target key start
LH: loop header
LB: loop body
LE: loop exit
PB: predicated region body
PF: predicated region fallthrough
CT: control target
= control target key end

     0   :  { %v1597_v1 = vmov 0   ;;  %vm39_vm0 = vcmask 64512   ;;  %vm55_vm1 = vsmask.f32 256  ;;  %vm56_vm2 = vsmask.f32 4368  ;;  %s1992_s1 = inlined_call_operand.vmem [shape: bf16[3,128,128], index: 1, kind: input, shape index: {}]   ;;  %s1993_s0 = inlined_call_operand.vmem [shape: f32[2,16,8], index: 0, kind: input, shape index: {}]   ;;  %s1994_s4 = inlined_call_operand.vmem [shape: bf16[3,128,128], index: 4, kind: input, shape index: {}]   ;;  %s1995_s2 = inlined_call_operand.vmem [shape: f32[1,128], index: 2, kind: input, shape index: {}]   ;;  %s1996_s3 = inlined_call_operand.vmem [shape: f32[1,128], index: 3, kind: input, shape index: {}]   ;;  %s1997_s5 = inlined_call_operand.vmem [shape: f32[1,128], index: 5, kind: input, shape index: {}]   ;;  %s1998_s6 = inlined_call_operand.vmem [shape: f32[1,128], index: 6, kind: input, shape index: {}]   ;;  %s1999_s7 = inlined_call_operand.vmem [shape: f32[2,16,8], index: 7, kind: output, shape index: {}]  }
   0x1   :  { %v1539_v0 = vld [vmem:[%s1992_s1 + $0x40] sm:$0xff]   ;;  %27 = vst [vmem:[#allocation2] sm:$0xf] %v1597_v1  ;;  %28 = vst [vmem:[#allocation2 + $0x4] sm:$0xf] %v1597_v1  ;;  %v1540_v2 = vld [vmem:[%s1992_s1 + $0x48] sm:$0xff]  }
   0x2   :  { %29 = vst [vmem:[#allocation2 + $0x8] sm:$0x1] %v1597_v1  ;;  %30 = vst [vmem:[#allocation2 + $0xc] sm:$0xf] %v1597_v1  ;;  %1402 = vmatprep.subr.bf16.mxu0 %v1539_v0  ;;  %v1541_v3 = vld [vmem:[%s1992_s1 + $0x50] sm:$0xff]   ;;  %v1542_v4 = vld [vmem:[%s1992_s1 + $0x58] sm:$0xff]  }
   0x3   :  { %31 = vst [vmem:[#allocation2 + $0x10] sm:$0xf] %v1597_v1  ;;  %32 = vst [vmem:[#allocation2 + $0x14] sm:$0x1] %v1597_v1  ;;  %1403 = vmatpush3.bf16.msra.mxu0 %v1539_v0  ;;  %v33_v5 = vld [vmem:[%s1993_s0] sm:$0xff]  ;;  %v34_v6 = vld [vmem:[%s1993_s0 + $0x8] sm:$0xff] }
   0x4   :  { %1404 = vmatprep.subr.bf16.mxu0 %v1540_v2  ;;  %v37_v7 = vpack.c.bf16 %v34_v6, %v33_v5  ;;  %v35_v9 = vld [vmem:[%s1993_s0 + $0x10] sm:$0xff]  ;;  %v1543_v10 = vld [vmem:[%s1992_s1 + $0x60] sm:$0xff]   ;;  %vm98_vm3 = vcmask 1043456   ;;  %vm99_vm4 = vsmask.f32 7938  ;;  %v36_v13 = vld [vmem:[%s1993_s0 + $0x18] sm:$0xff] }
   0x5   :  { %vm105_vm5 = vcmask 1040384   ;;  %v38_v14 = vpack.c.bf16 %v36_v13, %v35_v9  ;;  %v1544_v15 = vld [vmem:[%s1992_s1 + $0x68] sm:$0xff]   ;;  %vm1670_vm6 = vmor %vm55_vm1, %vm56_vm2  ;;  %v1545_v30 = vld [vmem:[%s1992_s1 + $0x70] sm:$0xff]   ;;  %vm139_vm9 = vsmask.f32 3328  ;;  %vm423_vm12 = vcmask 1042432  }
   0x6   :  { %v42_v8 = vsel %vm39_vm0, %v37_v7, 0  ;;  %vm1674_vm7 = vmand %vm98_vm3, %vm99_vm4  ;;  %v1546_v46 = vld [vmem:[%s1992_s1 + $0x78] sm:$0xff]   ;;  %vm140_vm10 = vsmask.f32 7440  ;;  %v1547_v54 = vld [vmem:[%s1992_s1] sm:$0xff]   ;;  %vm424_vm13 = vcmask 1046532  }
   0x7   :  { %1405 = vmatpush3.bf16.msra.mxu0 %v1540_v2  ;;  %v1200_v11 = vcombine.low %v42_v8, %v42_v8  ;;  %v1201_v12 = vcombine.high %v42_v8, %v42_v8  ;;  %v44_v23 = vsel %vm39_vm0, %v38_v14, 0  ;;  %vm1681_vm8 = vmand %vm105_vm5, %vm55_vm1 }
   0x8   :  { %1406 = vmatprep.subr.bf16.mxu0 %v1541_v3  ;;  %v101_v22 = vld [vmem:[#allocation2] sm:$0xf]  ;;  %v1202_v28 = vcombine.low %v44_v23, %v44_v23  ;;  %v1203_v29 = vcombine.high %v44_v23, %v44_v23  ;;  %vm1725_vm11 = vmor %vm139_vm9, %vm140_vm10 }
   0x9   :  { %v59_v17 = vshrl.u32 %v1200_v11, 16  ;;  %v62_v18 = vshll.u32 %v1200_v11, 16  ;;  %v67_v19 = vshrl.u32 %v1201_v12, 16  ;;  %v70_v20 = vshll.u32 %v1201_v12, 16  ;;  %v107_v27 = vld [vmem:[#allocation2 + $0x8] sm:$0x1]  ;;  %vm1768_vm14 = vmor %vm423_vm12, %vm424_vm13 }
   0xa   :  { %v76_v35 = vshrl.u32 %v1202_v28, 16  ;;  %v79_v36 = vshll.u32 %v1202_v28, 16  ;;  %v84_v37 = vshrl.u32 %v1203_v29, 16  ;;  %v87_v38 = vshll.u32 %v1203_v29, 16  ;;  %v110_v42 = vld [vmem:[#allocation2 + $0xc] sm:$0xf] }
   0xb   :  { %1407 = vmatpush3.bf16.msra.mxu0 %v1541_v3  ;;  %v61_v24 = vrot.slane %v59_v17, 7  ;;  %v69_v25 = vrot.slane %v67_v19, 7  ;;  %v114_v45 = vld [vmem:[#allocation2 + $0x14] sm:$0x1] }
   0xc   :  { %1408 = vmatprep.subr.bf16.mxu0 %v1542_v4  ;;  %v78_v43 = vrot.slane %v76_v35, 7  ;;  %v86_v44 = vrot.slane %v84_v37, 7  ;;  %v1549_v37 = vld [vmem:[%s1992_s1 + $0x10] sm:$0xff]  }
   0xd   :  { %v64_v31 = vor.u32 %v62_v18, %v61_v24  ;;  %v65_v32 = vrot.slane %v61_v24, 4  ;;  %v72_v33 = vor.u32 %v70_v20, %v69_v25  ;;  %v74_v34 = vrot.slane %v69_v25, 4 }
   0xe   :  { %v81_v47 = vor.u32 %v79_v36, %v78_v43  ;;  %v82_v48 = vrot.slane %v78_v43, 4  ;;  %v89_v49 = vor.u32 %v87_v38, %v86_v44  ;;  %v91_v50 = vrot.slane %v86_v44, 4  ;;  %v1548_v36 = vld [vmem:[%s1992_s1 + $0x8] sm:$0xff]   ;;  %v1550_v38 = vld [vmem:[%s1992_s1 + $0x18] sm:$0xff]  }
   0xf   :  { %1409 = vmatpush3.bf16.msra.mxu0 %v1542_v4  ;;  %v73_v39 = vsel %vm1670_vm6, %v65_v32, %v72_v33  ;;  %v102_v40 = vsel %vm1674_vm7, %v64_v31, %v101_v22  ;;  %v108_v41 = vsel %vm1681_vm8, %v74_v34, %v107_v27  ;;  %v1554_v43 = vld [vmem:[%s1992_s1 + $0x38] sm:$0xff]  }
  0x10   :  { %1410 = vmatprep.subr.bf16.mxu0 %v1543_v10  ;;  %103 = vst [vmem:[#allocation2] sm:$0xf] %v102_v40  ;;  %104 = vst [vmem:[#allocation2 + $0x4] sm:$0xf] %v73_v39  ;;  %v90_v51 = vsel %vm1670_vm6, %v82_v48, %v89_v49  ;;  %v111_v52 = vsel %vm1674_vm7, %v81_v47, %v110_v42  ;;  %v115_v53 = vsel %vm1681_vm8, %v91_v50, %v114_v45  ;;  %v1551_v39 = vld [vmem:[%s1992_s1 + $0x20] sm:$0xff]   ;;  %v1552_v40 = vld [vmem:[%s1992_s1 + $0x28] sm:$0xff]  }
  0x11   :  { %109 = vst [vmem:[#allocation2 + $0x8] sm:$0x1] %v108_v41  ;;  %112 = vst [vmem:[#allocation2 + $0xc] sm:$0xf] %v111_v52  ;;  %v1553_v41 = vld [vmem:[%s1992_s1 + $0x30] sm:$0xff]   ;;  %v1556_v48 = vld [vmem:[%s1992_s1 + $0x80] sm:$0xff]  }
  0x12   :  { %113 = vst [vmem:[#allocation2 + $0x10] sm:$0xf] %v90_v51  ;;  %116 = vst [vmem:[#allocation2 + $0x14] sm:$0x1] %v115_v53  ;;  %v1558_v53 = vld [vmem:[%s1992_s1 + $0x88] sm:$0xff]   ;;  %v1586_v47 = vld [vmem:[%s1994_s4 + $0x98] sm:$0xff]  }
  0x13   :  { %1411 = vmatpush3.bf16.msra.mxu0 %v1543_v10 }
  0x14   :  { %1412 = vmatprep.subr.bf16.mxu0 %v1544_v15 }
  0x17   :  { %1413 = vmatpush3.bf16.msra.mxu0 %v1544_v15  ;;  %v1706_v55 = vld [vmem:[#allocation2] sm:$0xf]  ;;  %v1708_v56 = vld [vmem:[#allocation2 + $0x4] sm:$0xf] }
  0x18   :  { %1414 = vmatprep.subr.bf16.mxu0 %v1545_v30  ;;  %v1710_v57 = vld [vmem:[#allocation2 + $0x8] sm:$0x1]  ;;  %v143_v58 = vshrl.u32 %v1706_v55, 16  ;;  %v146_v59 = vshll.u32 %v1706_v55, 16  ;;  %v152_v60 = vshll.u32 %v1708_v56, 16  ;;  %v156_v61 = vshrl.u32 %v1708_v56, 16 }
  0x19   :  { %v162_v62 = vshll.u32 %v1710_v57, 16  ;;  %v1717_v6 = vld [vmem:[#allocation2 + $0xc] sm:$0xf]  ;;  %v1719_v7 = vld [vmem:[#allocation2 + $0x10] sm:$0xf]  ;;  %v1230_v34 = vcombine.low %v1706_v55, %v1708_v56  ;;  %v428_v42 = vrot.slane %v1708_v56, 5 }
  0x1a   :  { %v145_v63 = vrot.slane %v143_v58, 4  ;;  %v148_v0 = vrot.slane %v146_v59, 5  ;;  %v154_v1 = vrot.slane %v152_v60, 5  ;;  %v158_v2 = vrot.slane %v156_v61, 4  ;;  %v1721_v8 = vld [vmem:[#allocation2 + $0x14] sm:$0x1] }
  0x1b   :  { %1415 = vmatpush3.bf16.msra.mxu0 %v1545_v30  ;;  %v164_v3 = vrot.slane %v162_v62, 5  ;;  %v167_v10 = vshrl.u32 %v1717_v6, 16  ;;  %v170_v11 = vshll.u32 %v1717_v6, 16  ;;  %v176_v12 = vshll.u32 %v1719_v7, 16  ;;  %v1560_v56 = vld [vmem:[%s1992_s1 + $0x98] sm:$0xff]   ;;  %v1562_v58 = vld [vmem:[%s1992_s1 + $0xa8] sm:$0xff]  }
  0x1c   :  { %1416 = vmatprep.subr.bf16.mxu0 %v1546_v46  ;;  %v149_v4 = vor.u32 %v148_v0, %v145_v63  ;;  %v159_v5 = vor.u32 %v158_v2, %v154_v1  ;;  %v180_v13 = vshrl.u32 %v1719_v7, 16  ;;  %v186_v17 = vshll.u32 %v1721_v8, 16  ;;  %v1563_v60 = vld [vmem:[%s1992_s1 + $0xb0] sm:$0xff]   ;;  %v1564_v0 = vld [vmem:[%s1992_s1 + $0xb8] sm:$0xff]  }
  0x1d   :  { %v169_v18 = vrot.slane %v167_v10, 4  ;;  %v172_v19 = vrot.slane %v170_v11, 5  ;;  %v178_v20 = vrot.slane %v176_v12, 5  ;;  %v1240_v44 = vrot.slane %v1706_v55, 9  ;;  %v1570_v10 = vld [vmem:[%s1994_s4 + $0x68] sm:$0xff]   ;;  %v1571_v11 = vld [vmem:[%s1994_s4 + $0x70] sm:$0xff]  }
  0x1e   :  { %v150_v14 = vrot.slane %v149_v4, 4  ;;  %v160_v15 = vrot.slane %v159_v5, 4  ;;  %v182_v22 = vrot.slane %v180_v13, 4  ;;  %v188_v29 = vrot.slane %v186_v17, 5  ;;  %v1565_v4 = vld [vmem:[%s1994_s4 + $0x40] sm:$0xff]   ;;  %v1566_v5 = vld [vmem:[%s1994_s4 + $0x48] sm:$0xff]  }
  0x1f   :  { %1417 = vmatpush3.bf16.msra.mxu0 %v1546_v46  ;;  %v173_v27 = vor.u32 %v172_v19, %v169_v18  ;;  %v430_v45 = vrot.slane %v428_v42, 4  ;;  %v431_v46 = vrot.slane %v1710_v57, 5  ;;  %v429_v49 = vsel %vm1768_vm14, %v1240_v44, %v428_v42  ;;  %v1561_v57 = vld [vmem:[%s1992_s1 + $0xa0] sm:$0xff]   ;;  %1462 = vmatprep.subr.bf16.mxu1 %v1565_v4  ;;  %v1572_v12 = vld [vmem:[%s1994_s4 + $0x78] sm:$0xff]  }
  0x20   :  { %1422 = vmatprep.subr.bf16.mxu0 %v1547_v54  ;;  %v155_v23 = vsel %vm1725_vm11, %v150_v14, %v154_v1  ;;  %v165_v24 = vsel %vm1725_vm11, %v160_v15, %v164_v3  ;;  %v183_v28 = vor.u32 %v182_v22, %v178_v20  ;;  %v1231_v51 = vcombine.low %v1717_v6, %v1719_v7  ;;  %v1836_v13 = vld [vmem:[%s1994_s4] sm:$0xff]  }
  0x21   :  { %v1220_v25 = vcombine.low %v155_v23, %v165_v24  ;;  %v174_v30 = vrot.slane %v173_v27, 4  ;;  %v432_v50 = vsel %vm1768_vm14, %v430_v45, %v431_v46  ;;  %v435_v59 = vrot.slane %v1719_v7, 5  ;;  %1463 = vmatpush3.bf16.msra.mxu1 %v1565_v4  ;;  %v1568_v7 = vld [vmem:[%s1994_s4 + $0x58] sm:$0xff]  }
  0x22   :  { %v184_v31 = vrot.slane %v183_v28, 4  ;;  %v1258_v52 = vcombine.low %v429_v49, %v432_v50  ;;  %v1241_v61 = vrot.slane %v1717_v6, 9  ;;  %v438_v63 = vrot.slane %v1721_v8, 5  ;;  %1464 = vmatprep.subr.bf16.mxu1 %v1566_v5  ;;  %v1567_v6 = vld [vmem:[%s1994_s4 + $0x50] sm:$0xff]   ;;  %v1569_v8 = vld [vmem:[%s1994_s4 + $0x60] sm:$0xff]  }
  0x23   :  { %1418 = vmatprep.mubr.bf16.mxu0 %v1220_v25  ;;  %v179_v32 = vsel %vm1725_vm11, %v174_v30, %v178_v20  ;;  %v437_v62 = vrot.slane %v435_v59, 4 }
  0x24   :  { %v189_v33 = vsel %vm1725_vm11, %v184_v31, %v188_v29  ;;  %v436_v1 = vsel %vm1768_vm14, %v1241_v61, %v435_v59  ;;  %v1268_v59 = vld [vmem:[%s1996_s3] ss:$0 sm:$0xff] }
  0x25   :  { %v1221_v35 = vcombine.low %v179_v32, %v189_v33  ;;  %v439_v2 = vsel %vm1768_vm14, %v437_v62, %v438_v63  ;;  %1465 = vmatpush3.bf16.msra.mxu1 %v1566_v5 }
  0x26   :  { %v1259_v3 = vcombine.low %v436_v1, %v439_v2  ;;  %1466 = vmatprep.subr.bf16.mxu1 %v1567_v6 }
  0x27   :  { %1419 = vmatmul.mubr.bf16.vlgmr.msra.gmra.mrb[0].mxu0 %v1221_v35 }
  0x28   :  { %1423 = vmatpush3.bf16.msra.mxu0 %v1547_v54  ;;  %1438 = vmatprep.mubr.bf16.mxu0 %v1230_v34  ;;  %v1559_v54 = vld [vmem:[%s1992_s1 + $0x90] sm:$0xff]  }
  0x29   :  { %1424 = vmatprep.subr.bf16.mxu0 %v1548_v36  ;;  %1467 = vmatpush3.bf16.msra.mxu1 %v1567_v6 }
  0x2a   :  { %1468 = vmatprep.subr.bf16.mxu1 %v1568_v7 }
  0x2c   :  { %1425 = vmatpush3.bf16.msra.mxu0 %v1548_v36 }
  0x2d   :  { %1426 = vmatprep.subr.bf16.mxu0 %v1549_v37  ;;  %1469 = vmatpush3.bf16.msra.mxu1 %v1568_v7 }
  0x2e   :  { %1470 = vmatprep.subr.bf16.mxu1 %v1569_v8 }
  0x30   :  { %1427 = vmatpush3.bf16.msra.mxu0 %v1549_v37 }
  0x31   :  { %1428 = vmatprep.subr.bf16.mxu0 %v1550_v38  ;;  %1471 = vmatpush3.bf16.msra.mxu1 %v1569_v8 }
  0x32   :  { %1472 = vmatprep.subr.bf16.mxu1 %v1570_v10 }
  0x34   :  { %1429 = vmatpush3.bf16.msra.mxu0 %v1550_v38 }
  0x35   :  { %1430 = vmatprep.subr.bf16.mxu0 %v1551_v39  ;;  %1473 = vmatpush3.bf16.msra.mxu1 %v1570_v10 }
  0x36   :  { %1474 = vmatprep.subr.bf16.mxu1 %v1571_v11 }
  0x38   :  { %1431 = vmatpush3.bf16.msra.mxu0 %v1551_v39 }
  0x39   :  { %1432 = vmatprep.subr.bf16.mxu0 %v1552_v40  ;;  %1475 = vmatpush3.bf16.msra.mxu1 %v1571_v11 }
  0x3a   :  { %1476 = vmatprep.subr.bf16.mxu1 %v1572_v12 }
  0x3c   :  { %1433 = vmatpush3.bf16.msra.mxu0 %v1552_v40 }
  0x3d   :  { %1434 = vmatprep.subr.bf16.mxu0 %v1553_v41  ;;  %1477 = vmatpush3.bf16.msra.mxu1 %v1572_v12 }
  0x3e   :  { %1482 = vmatprep.subr.bf16.mxu1 %v1836_v13 }
  0x40   :  { %1435 = vmatpush3.bf16.msra.mxu0 %v1553_v41 }
  0x41   :  { %1436 = vmatprep.subr.bf16.mxu0 %v1554_v43 }
  0x44   :  { %1437 = vmatpush3.bf16.msra.mxu0 %v1554_v43 }
  0x45   :  { %1442 = vmatprep.subr.bf16.mxu0 %v1556_v48 }
  0x47   :  { %1439 = vmatmul.mubr.bf16.vlgmr.msra.gmra.mrb[0].mxu0 %v1231_v51  ;;  %v598_v51 = vlaneseq }
  0x48   :  { %1443 = vmatpush3.bf16.msra.mxu0 %v1556_v48  ;;  %1458 = vmatprep.mubr.bf16.mxu0 %v1258_v52 }
  0x49   :  { %1444 = vmatprep.subr.bf16.mxu0 %v1558_v53  ;;  %v1839_v52 = vshrl.u32 %v598_v51, 7 }
  0x4c   :  { %1445 = vmatpush3.bf16.msra.mxu0 %v1558_v53  ;;  %v596_v53 = vld [vmem:[%s1995_s2] sm:$0x1] }
  0x4d   :  { %1446 = vmatprep.subr.bf16.mxu0 %v1559_v54 }
  0x50   :  { %1447 = vmatpush3.bf16.msra.mxu0 %v1559_v54  ;;  %v600_v54 = vsub.s32 0, %v1839_v52 }
  0x51   :  { %1448 = vmatprep.subr.bf16.mxu0 %v1560_v56 }
  0x54   :  { %1449 = vmatpush3.bf16.msra.mxu0 %v1560_v56 }
  0x55   :  { %1450 = vmatprep.subr.bf16.mxu0 %v1561_v57 }
  0x58   :  { %1451 = vmatpush3.bf16.msra.mxu0 %v1561_v57 }
  0x59   :  { %1452 = vmatprep.subr.bf16.mxu0 %v1562_v58 }
  0x5c   :  { %1453 = vmatpush3.bf16.msra.mxu0 %v1562_v58 }
  0x5d   :  { %1454 = vmatprep.subr.bf16.mxu0 %v1563_v60 }
  0x60   :  { %1455 = vmatpush3.bf16.msra.mxu0 %v1563_v60 }
  0x61   :  { %1456 = vmatprep.subr.bf16.mxu0 %v1564_v0 }
  0x64   :  { %1457 = vmatpush3.bf16.msra.mxu0 %v1564_v0 }
  0x67   :  { %1459 = vmatmul.mubr.bf16.vlgmr.msra.gmra.mrb[0].mxu0 %v1259_v3 }
 0x13a   :  { %v1460_v14 = vpop.f32.mrb[0].mxu0 }
 0x13b   :  { %v547_v15 = vpop.f32.mrb[1].mxu0 }
 0x13c   :  { %v1461_v17 = vpop.f32.mrb[2].mxu0 }
 0x13d   :  { %v550_v18 = vpop.f32.mrb[3].mxu0 }
 0x13e   :  { %v566_v19 = vadd.f32 %v550_v18, %v547_v15 }
 0x140   :  { %v567_v20 = vadd.f32 %v1460_v14, %v566_v19 }
 0x142   :  { %v568_v22 = vadd.f32 %v1461_v17, %v567_v20 }
 0x144   :  { %v569_v23 = vrot.slane %v568_v22, 4 }
 0x146   :  { %v570_v24 = vadd.f32 %v569_v23, %v568_v22 }
 0x148   :  { %v571_v25 = vrot.slane %v570_v24, 2 }
 0x14a   :  { %v572_v27 = vadd.f32 %v571_v25, %v570_v24 }
 0x14c   :  { %v573_v28 = vrot.slane %v572_v27, 1 }
 0x14e   :  { %v574_v29 = vadd.f32 %v573_v28, %v572_v27 }
 0x150   :  { %v575_v30 = vmul.f32 0.03125, %v574_v29  ;;  %v676_v29 = vld [vmem:[#allocation2 + $0x8] sm:$0x1] }
 0x152   :  { %v576_v31 = vsub.f32 %v547_v15, %v575_v30  ;;  %v577_v32 = vsub.f32 %v550_v18, %v575_v30  ;;  %v578_v33 = vsub.f32 %v1460_v14, %v575_v30  ;;  %v579_v34 = vsub.f32 %v1461_v17, %v575_v30 }
 0x154   :  { %v580_v35 = vmul.f32 %v576_v31, %v576_v31  ;;  %v581_v36 = vmul.f32 %v577_v32, %v577_v32  ;;  %v582_v37 = vmul.f32 %v578_v33, %v578_v33  ;;  %v583_v39 = vmul.f32 %v579_v34, %v579_v34 }
 0x156   :  { %v584_v38 = vadd.f32 %v581_v36, %v580_v35  ;;  %v683_v35 = vld [vmem:[#allocation2 + $0x14] sm:$0x1] }
 0x158   :  { %v585_v40 = vadd.f32 %v584_v38, %v582_v37 }
 0x15a   :  { %v586_v41 = vadd.f32 %v585_v40, %v583_v39 }
 0x15c   :  { %v587_v42 = vrot.slane %v586_v41, 4 }
 0x15e   :  { %v588_v43 = vadd.f32 %v587_v42, %v586_v41 }
 0x160   :  { %v589_v44 = vrot.slane %v588_v43, 2 }
 0x162   :  { %v590_v45 = vadd.f32 %v589_v44, %v588_v43 }
 0x164   :  { %v591_v46 = vrot.slane %v590_v45, 1 }
 0x166   :  { %v592_v48 = vadd.f32 %v591_v46, %v590_v45 }
 0x168   :  { %v593_v49 = vmul.f32 0.03125, %v592_v48 }
 0x16a   :  { %v594_v50 = vadd.f32 1e-05, %v593_v49 }
 0x16c   :  { %1591 = vrsqrt.f32 %v594_v50 }
 0x176   :  { %v1592_v56 = vpop.eup %1591 }
 0x177   :  { %v597_v57 = vmul.f32 %v1592_v56, %v596_v53 }
 0x179   :  { %v601_v58 = vrot.slane %v597_v57, %v600_v54 }
 0x17b   :  { %v602_v60 = vmul.f32 %v601_v58, %v576_v31  ;;  %v603_v61 = vmul.f32 %v601_v58, %v577_v32  ;;  %v604_v62 = vmul.f32 %v601_v58, %v578_v33  ;;  %v605_v63 = vmul.f32 %v601_v58, %v579_v34  ;;  %v679_v34 = vld [vmem:[#allocation2 + $0xc] sm:$0xf] }
 0x17d   :  { %v613_v0 = vadd.f32 %v1268_v59, %v602_v60  ;;  %v614_v1 = vadd.f32 %v1268_v59, %v603_v61  ;;  %v615_v2 = vadd.f32 %v1268_v59, %v604_v62  ;;  %v616_v3 = vadd.f32 %v1268_v59, %v605_v63 }
 0x17f   :  { %v617_v4 = vmax.f32 %v613_v0, 0.0  ;;  %v618_v5 = vmax.f32 %v614_v1, 0.0  ;;  %v619_v6 = vmax.f32 %v615_v2, 0.0  ;;  %v620_v7 = vmax.f32 %v616_v3, 0.0 }
 0x181   :  { %v1338_v8 = vpack.c.bf16 %v617_v4, %v617_v4  ;;  %v1339_v10 = vpack.c.bf16 %v618_v5, %v618_v5  ;;  %v1340_v11 = vpack.c.bf16 %v619_v6, %v619_v6  ;;  %v1341_v12 = vpack.c.bf16 %v620_v7, %v620_v7 }
 0x183   :  { %v634_v14 = vshrl.u32 %v1338_v8, 16  ;;  %v642_v15 = vshrl.u32 %v1339_v10, 16  ;;  %v651_v17 = vshrl.u32 %v1340_v11, 16  ;;  %v659_v18 = vshrl.u32 %v1341_v12, 16 }
 0x184   :  { %v637_v20 = vshll.u32 %v1338_v8, 16  ;;  %v645_v23 = vshll.u32 %v1339_v10, 16  ;;  %v654_v25 = vshll.u32 %v1340_v11, 16  ;;  %v662_v28 = vshll.u32 %v1341_v12, 16 }
 0x185   :  { %v636_v19 = vrot.slane %v634_v14, 7  ;;  %v644_v22 = vrot.slane %v642_v15, 7  ;;  %v653_v24 = vrot.slane %v651_v17, 7  ;;  %v661_v27 = vrot.slane %v659_v18, 7 }
 0x187   :  { %v639_v30 = vor.u32 %v637_v20, %v636_v19  ;;  %v640_v31 = vrot.slane %v636_v19, 4  ;;  %v647_v32 = vor.u32 %v645_v23, %v644_v22  ;;  %v649_v33 = vrot.slane %v644_v22, 4 }
 0x188   :  { %v656_v36 = vor.u32 %v654_v25, %v653_v24  ;;  %v657_v37 = vrot.slane %v653_v24, 4  ;;  %v664_v38 = vor.u32 %v662_v28, %v661_v27  ;;  %v666_v39 = vrot.slane %v661_v27, 4 }
 0x189   :  { %v648_v40 = vsel %vm1670_vm6, %v640_v31, %v647_v32  ;;  %v673_v41 = vsel %vm1674_vm7, %v639_v30, %v1706_v55  ;;  %v677_v42 = vsel %vm1681_vm8, %v649_v33, %v676_v29  ;;  %v1575_v32 = vld [vmem:[%s1994_s4 + $0x8] sm:$0xff]  }
 0x18a   :  { %v665_v43 = vsel %vm1670_vm6, %v657_v37, %v664_v38  ;;  %674 = vst [vmem:[#allocation2] sm:$0xf] %v673_v41  ;;  %675 = vst [vmem:[#allocation2 + $0x4] sm:$0xf] %v648_v40  ;;  %v680_v44 = vsel %vm1674_vm7, %v656_v36, %v679_v34  ;;  %v684_v45 = vsel %vm1681_vm8, %v666_v39, %v683_v35  ;;  %v1576_v35 = vld [vmem:[%s1994_s4 + $0x10] sm:$0xff]   ;;  %v1577_v36 = vld [vmem:[%s1994_s4 + $0x18] sm:$0xff]  }
 0x18b   :  { %678 = vst [vmem:[#allocation2 + $0x8] sm:$0x1] %v677_v42  ;;  %681 = vst [vmem:[#allocation2 + $0xc] sm:$0xf] %v680_v44  ;;  %v1578_v37 = vld [vmem:[%s1994_s4 + $0x20] sm:$0xff]   ;;  %v1580_v38 = vld [vmem:[%s1994_s4 + $0x30] sm:$0xff]  }
 0x18c   :  { %682 = vst [vmem:[#allocation2 + $0x10] sm:$0xf] %v665_v43  ;;  %685 = vst [vmem:[#allocation2 + $0x14] sm:$0x1] %v684_v45  ;;  %v1581_v40 = vld [vmem:[%s1994_s4 + $0x38] sm:$0xff]   ;;  %v1583_v43 = vld [vmem:[%s1994_s4 + $0x80] sm:$0xff]  }
 0x191   :  { %v1863_v46 = vld [vmem:[#allocation2] sm:$0xf]  ;;  %v1865_v55 = vld [vmem:[#allocation2 + $0x4] sm:$0xf] }
 0x192   :  { %v1867_v48 = vld [vmem:[#allocation2 + $0x8] sm:$0x1]  ;;  %v709_v16 = vshrl.u32 %v1863_v46, 16  ;;  %v712_v49 = vshll.u32 %v1863_v46, 16  ;;  %v718_v50 = vshll.u32 %v1865_v55, 16  ;;  %v722_v21 = vshrl.u32 %v1865_v55, 16 }
 0x193   :  { %v1873_v51 = vld [vmem:[#allocation2 + $0xc] sm:$0xf]  ;;  %v728_v26 = vshll.u32 %v1867_v48, 16  ;;  %v1876_v53 = vld [vmem:[#allocation2 + $0x10] sm:$0xf]  ;;  %v1299_v33 = vcombine.low %v1863_v46, %v1865_v55  ;;  %v991_v39 = vrot.slane %v1865_v55, 5 }
 0x194   :  { %v711_v56 = vrot.slane %v709_v16, 4  ;;  %v714_v57 = vrot.slane %v712_v49, 5  ;;  %v720_v58 = vrot.slane %v718_v50, 5  ;;  %v724_v59 = vrot.slane %v722_v21, 4  ;;  %v691_v60 = vld [vmem:[#allocation2 + $0x14] sm:$0x1] }
 0x195   :  { %v733_v61 = vshrl.u32 %v1873_v51, 16  ;;  %v736_v62 = vshll.u32 %v1873_v51, 16  ;;  %v742_v63 = vshll.u32 %v1876_v53, 16  ;;  %v746_v2 = vshrl.u32 %v1876_v53, 16  ;;  %v1587_v50 = vld [vmem:[%s1994_s4 + $0xa0] sm:$0xff]   ;;  %v1588_v21 = vld [vmem:[%s1994_s4 + $0xa8] sm:$0xff]  }
 0x196   :  { %v715_v0 = vor.u32 %v714_v57, %v711_v56  ;;  %v725_v1 = vor.u32 %v724_v59, %v720_v58  ;;  %v730_v3 = vrot.slane %v728_v26, 5  ;;  %v752_v11 = vshll.u32 %v691_v60, 16  ;;  %v1590_v26 = vld [vmem:[%s1994_s4 + $0xb8] sm:$0xff]  }
 0x197   :  { %v735_v4 = vrot.slane %v733_v61, 4  ;;  %v738_v5 = vrot.slane %v736_v62, 5  ;;  %v744_v6 = vrot.slane %v742_v63, 5  ;;  %v748_v10 = vrot.slane %v746_v2, 4 }
 0x198   :  { %v716_v7 = vrot.slane %v715_v0, 4  ;;  %v726_v8 = vrot.slane %v725_v1, 4  ;;  %v1310_v18 = vrot.slane %v1873_v51, 9  ;;  %v754_v23 = vrot.slane %v752_v11, 5 }
 0x199   :  { %v739_v12 = vor.u32 %v738_v5, %v735_v4  ;;  %v749_v17 = vor.u32 %v748_v10, %v744_v6  ;;  %v998_v24 = vrot.slane %v1876_v53, 5  ;;  %v1001_v28 = vrot.slane %v691_v60, 5 }
 0x19a   :  { %v721_v14 = vsel %vm1725_vm11, %v716_v7, %v720_v58  ;;  %v731_v15 = vsel %vm1725_vm11, %v726_v8, %v730_v3  ;;  %v993_v41 = vrot.slane %v991_v39, 4  ;;  %v994_v42 = vrot.slane %v1867_v48, 5  ;;  %v1584_v48 = vld [vmem:[%s1994_s4 + $0x88] sm:$0xff]  }
 0x19b   :  { %v1289_v19 = vcombine.low %v721_v14, %v731_v15  ;;  %v740_v20 = vrot.slane %v739_v12, 4  ;;  %v750_v22 = vrot.slane %v749_v17, 4  ;;  %v1894_v29 = vsel %vm1768_vm14, %v1310_v18, %v998_v24 }
 0x19c   :  { %v1000_v30 = vrot.slane %v998_v24, 4  ;;  %v1309_v44 = vrot.slane %v1863_v46, 9  ;;  %v995_v45 = vsel %vm1768_vm14, %v993_v41, %v994_v42  ;;  %v1300_v55 = vcombine.low %v1873_v51, %v1876_v53  ;;  %v1585_v46 = vld [vmem:[%s1994_s4 + $0x90] sm:$0xff]  }
 0x19d   :  { %1478 = vmatprep.mubr.bf16.mxu1 %v1289_v19  ;;  %v745_v25 = vsel %vm1725_vm11, %v740_v20, %v744_v6  ;;  %v755_v27 = vsel %vm1725_vm11, %v750_v22, %v754_v23  ;;  %v1589_v51 = vld [vmem:[%s1994_s4 + $0xb0] sm:$0xff]  }
 0x19e   :  { %v1290_v31 = vcombine.low %v745_v25, %v755_v27  ;;  %v1002_v34 = vsel %vm1768_vm14, %v1000_v30, %v1001_v28  ;;  %v992_v16 = vsel %vm1768_vm14, %v1309_v44, %v991_v39  ;;  %v1595_v42 = vld [vmem:[%s1993_s0 + $0x10] sm:$0xff]  ;;  %v1596_v44 = vld [vmem:[%s1993_s0 + $0x18] sm:$0xff] }
 0x19f   :  { %v1328_v9 = vcombine.low %v1894_v29, %v1002_v34  ;;  %v1327_v49 = vcombine.low %v992_v16, %v995_v45  ;;  %v1159_v29 = vld [vmem:[%s1997_s5] sm:$0x1] }
 0x1a0   :  { %1479 = vmatmul.mubr.bf16.vlgmr.msra.gmra.mrb[0].mxu1 %v1290_v31 }
 0x1a1   :  { %1483 = vmatpush3.bf16.msra.mxu1 %v1836_v13  ;;  %1498 = vmatprep.mubr.bf16.mxu1 %v1299_v33  ;;  %v1579_v13 = vld [vmem:[%s1994_s4 + $0x28] sm:$0xff]   ;;  %v1337_v33 = vld [vmem:[%s1998_s6] ss:$0 sm:$0xff] }
 0x1a2   :  { %1484 = vmatprep.subr.bf16.mxu1 %v1575_v32 }
 0x1a5   :  { %1485 = vmatpush3.bf16.msra.mxu1 %v1575_v32 }
 0x1a6   :  { %1486 = vmatprep.subr.bf16.mxu1 %v1576_v35 }
 0x1a9   :  { %1487 = vmatpush3.bf16.msra.mxu1 %v1576_v35 }
 0x1aa   :  { %1488 = vmatprep.subr.bf16.mxu1 %v1577_v36 }
 0x1ad   :  { %1489 = vmatpush3.bf16.msra.mxu1 %v1577_v36 }
 0x1ae   :  { %1490 = vmatprep.subr.bf16.mxu1 %v1578_v37 }
 0x1b1   :  { %1491 = vmatpush3.bf16.msra.mxu1 %v1578_v37  ;;  %v1180_v37 = vld [vmem:[%s1993_s0] sm:$0xff] }
 0x1b2   :  { %1492 = vmatprep.subr.bf16.mxu1 %v1579_v13 }
 0x1b5   :  { %1493 = vmatpush3.bf16.msra.mxu1 %v1579_v13  ;;  %v1181_v13 = vld [vmem:[%s1993_s0 + $0x8] sm:$0xff] }
 0x1b6   :  { %1494 = vmatprep.subr.bf16.mxu1 %v1580_v38 }
 0x1b9   :  { %1495 = vmatpush3.bf16.msra.mxu1 %v1580_v38 }
 0x1ba   :  { %1496 = vmatprep.subr.bf16.mxu1 %v1581_v40 }
 0x1bd   :  { %1497 = vmatpush3.bf16.msra.mxu1 %v1581_v40 }
 0x1be   :  { %1502 = vmatprep.subr.bf16.mxu1 %v1583_v43 }
 0x1c0   :  { %1499 = vmatmul.mubr.bf16.vlgmr.msra.gmra.mrb[0].mxu1 %v1300_v55 }
 0x1c1   :  { %1503 = vmatpush3.bf16.msra.mxu1 %v1583_v43  ;;  %1518 = vmatprep.mubr.bf16.mxu1 %v1327_v49 }
 0x1c2   :  { %1504 = vmatprep.subr.bf16.mxu1 %v1584_v48 }
 0x1c5   :  { %1505 = vmatpush3.bf16.msra.mxu1 %v1584_v48 }
 0x1c6   :  { %1506 = vmatprep.subr.bf16.mxu1 %v1585_v46 }
 0x1c9   :  { %1507 = vmatpush3.bf16.msra.mxu1 %v1585_v46 }
 0x1ca   :  { %1508 = vmatprep.subr.bf16.mxu1 %v1586_v47 }
 0x1cd   :  { %1509 = vmatpush3.bf16.msra.mxu1 %v1586_v47 }
 0x1ce   :  { %1510 = vmatprep.subr.bf16.mxu1 %v1587_v50 }
 0x1d1   :  { %1511 = vmatpush3.bf16.msra.mxu1 %v1587_v50 }
 0x1d2   :  { %1512 = vmatprep.subr.bf16.mxu1 %v1588_v21 }
 0x1d5   :  { %1513 = vmatpush3.bf16.msra.mxu1 %v1588_v21 }
 0x1d6   :  { %1514 = vmatprep.subr.bf16.mxu1 %v1589_v51 }
 0x1d9   :  { %1515 = vmatpush3.bf16.msra.mxu1 %v1589_v51 }
 0x1da   :  { %1516 = vmatprep.subr.bf16.mxu1 %v1590_v26 }
 0x1dd   :  { %1517 = vmatpush3.bf16.msra.mxu1 %v1590_v26 }
 0x1e0   :  { %1519 = vmatmul.mubr.bf16.vlgmr.msra.gmra.mrb[0].mxu1 %v1328_v9 }
 0x2b3   :  { %v1520_v53 = vpop.f32.mrb[0].mxu1 }
 0x2b4   :  { %v1110_v56 = vpop.f32.mrb[1].mxu1 }
 0x2b5   :  { %v1521_v57 = vpop.f32.mrb[2].mxu1 }
 0x2b6   :  { %v1113_v58 = vpop.f32.mrb[3].mxu1 }
 0x2b7   :  { %v1129_v59 = vadd.f32 %v1113_v58, %v1110_v56 }
 0x2b9   :  { %v1130_v60 = vadd.f32 %v1520_v53, %v1129_v59 }
 0x2bb   :  { %v1131_v61 = vadd.f32 %v1521_v57, %v1130_v60 }
 0x2bd   :  { %v1132_v62 = vrot.slane %v1131_v61, 4 }
 0x2bf   :  { %v1133_v63 = vadd.f32 %v1132_v62, %v1131_v61 }
 0x2c1   :  { %v1134_v0 = vrot.slane %v1133_v63, 2 }
 0x2c3   :  { %v1135_v1 = vadd.f32 %v1134_v0, %v1133_v63 }
 0x2c5   :  { %v1136_v2 = vrot.slane %v1135_v1, 1 }
 0x2c7   :  { %v1137_v3 = vadd.f32 %v1136_v2, %v1135_v1 }
 0x2c9   :  { %v1138_v4 = vmul.f32 0.03125, %v1137_v3 }
 0x2cb   :  { %v1139_v5 = vsub.f32 %v1110_v56, %v1138_v4  ;;  %v1140_v6 = vsub.f32 %v1113_v58, %v1138_v4  ;;  %v1141_v7 = vsub.f32 %v1520_v53, %v1138_v4  ;;  %v1142_v8 = vsub.f32 %v1521_v57, %v1138_v4 }
 0x2cd   :  { %v1143_v10 = vmul.f32 %v1139_v5, %v1139_v5  ;;  %v1144_v11 = vmul.f32 %v1140_v6, %v1140_v6  ;;  %v1145_v12 = vmul.f32 %v1141_v7, %v1141_v7  ;;  %v1146_v15 = vmul.f32 %v1142_v8, %v1142_v8 }
 0x2cf   :  { %v1147_v14 = vadd.f32 %v1144_v11, %v1143_v10 }
 0x2d1   :  { %v1148_v17 = vadd.f32 %v1147_v14, %v1145_v12 }
 0x2d3   :  { %v1149_v18 = vadd.f32 %v1148_v17, %v1146_v15 }
 0x2d5   :  { %v1150_v19 = vrot.slane %v1149_v18, 4 }
 0x2d7   :  { %v1151_v20 = vadd.f32 %v1150_v19, %v1149_v18 }
 0x2d9   :  { %v1152_v22 = vrot.slane %v1151_v20, 2 }
 0x2db   :  { %v1153_v23 = vadd.f32 %v1152_v22, %v1151_v20 }
 0x2dd   :  { %v1154_v24 = vrot.slane %v1153_v23, 1 }
 0x2df   :  { %v1155_v25 = vadd.f32 %v1154_v24, %v1153_v23 }
 0x2e1   :  { %v1156_v27 = vmul.f32 0.03125, %v1155_v25 }
 0x2e3   :  { %v1157_v28 = vadd.f32 1e-05, %v1156_v27 }
 0x2e5   :  { %1593 = vrsqrt.f32 %v1157_v28 }
 0x2ef   :  { %v1594_v30 = vpop.eup %1593 }
 0x2f0   :  { %v1160_v31 = vmul.f32 %v1594_v30, %v1159_v29 }
 0x2f2   :  { %v1164_v32 = vrot.slane %v1160_v31, %v600_v54 }
 0x2f4   :  { %v1165_v34 = vmul.f32 %v1164_v32, %v1139_v5  ;;  %v1166_v9 = vmul.f32 %v1164_v32, %v1140_v6  ;;  %v1167_v35 = vmul.f32 %v1164_v32, %v1141_v7  ;;  %v1168_v36 = vmul.f32 %v1164_v32, %v1142_v8 }
 0x2f6   :  { %v1176_v38 = vadd.f32 %v1337_v33, %v1165_v34  ;;  %v1177_v39 = vadd.f32 %v1337_v33, %v1166_v9  ;;  %v1178_v52 = vadd.f32 %v1337_v33, %v1167_v35  ;;  %v1179_v54 = vadd.f32 %v1337_v33, %v1168_v36 }
 0x2f8   :  { %v1184_v40 = vadd.f32 %v1180_v37, %v1176_v38  ;;  %v1185_v41 = vadd.f32 %v1181_v13, %v1177_v39  ;;  %v1186_v43 = vadd.f32 %v1595_v42, %v1178_v52  ;;  %v1187_v45 = vadd.f32 %v1596_v44, %v1179_v54 }
 0x2fa   :  { %v1188_v55 = vmax.f32 %v1184_v40, 0.0  ;;  %v1189_v16 = vmax.f32 %v1185_v41, 0.0  ;;  %v1190_v48 = vmax.f32 %v1186_v43, 0.0  ;;  %v1191_v49 = vmax.f32 %v1187_v45, 0.0 }
 0x2fc   :  { %1192 = vst.msk [vmem:[%s1999_s7] sm:$0xff] %vm39_vm0, %v1188_v55  ;;  %1193 = vst.msk [vmem:[%s1999_s7 + $0x8] sm:$0xff] %vm39_vm0, %v1189_v16 }
 0x2fd   :  { %1194 = vst.msk [vmem:[%s1999_s7 + $0x10] sm:$0xff] %vm39_vm0, %v1190_v48  ;;  %1195 = vst.msk [vmem:[%s1999_s7 + $0x18] sm:$0xff] %vm39_vm0, %v1191_v49 }

</bundles_post_ra>
